<compile_context>
chip_gen: v7x
topology: tpu7x:2x2x1
jax: 0.10.0
libtpu: 0.0.40
codegen_flags: <defaults>
</compile_context>

<pallas_src>
import functools
import math

import jax
import jax.numpy as jnp
from jax.experimental import pallas as pl
from jax.experimental.pallas import tpu as pltpu


def _label_smoothing_kernel(x_ref, tgt_ref, td_ref, part_ref, *, confidence, smooth_val):
    """One N-tile: build the smoothed target distribution, write it, emit -sum(td*x)."""
    x = x_ref[...].astype(jnp.float32)                 # (tn, V) log-probs, f32 math
    tgt = tgt_ref[...]                                 # (tn, 1) int32 class indices

    # scatter_(1, target, confidence) as a lane-index compare (no gather/scatter needed)
    col = jax.lax.broadcasted_iota(jnp.int32, x.shape, 1)
    td = jnp.where(col == tgt, jnp.float32(confidence), jnp.float32(smooth_val))
    td_ref[...] = td.astype(td_ref.dtype)

    # Data-dependent part of KLDivLoss(reduction='sum'): -sum(td * x).
    # The constant sum(td*log(td)) term is added in the wrapper (closed form per row).
    partial = -jnp.sum(td * x)
    part_ref[...] = jnp.broadcast_to(partial, part_ref.shape).astype(jnp.float32)


def _xlogy_const(t):
    """x*log(x) with the 0*log(0)=0 convention (matches PyTorch's xlogy)."""
    t = float(t)
    return t * math.log(t) if t > 0.0 else 0.0


def label_smoothing_loss(x, target, size, smoothing=0.0, tile_n=None):
    """x: (N, size) float32 log-probs; target: (N,) int class indices.

    Returns (loss_scalar, true_dist) matching PyTorch LabelSmoothing.forward
    (the KLDivLoss(reduction='sum') value and the stored self.true_dist).
    """
    N, V = x.shape
    assert V == size
    confidence = 1.0 - smoothing
    smooth_val = smoothing / (size - 1)

    tgt2d = target.reshape(N, 1).astype(jnp.int32)

    # ---- tile selection: N-tiles x full-V blocks ----------------------------------
    row_bytes = V * 4
    if tile_n is None:
        per_buffer_budget = 8 * 1024 * 1024            # fits v7x 64 MiB with in+out dbl-buffered
        tile_n = max(8, min(512, per_buffer_budget // row_bytes))
    tile_n = max(8, (tile_n // 8) * 8)                 # sublane multiple of 8
    n_rounded = ((N + 7) // 8) * 8
    tile_n = min(tile_n, n_rounded)
    num_tiles = pl.cdiv(N, tile_n)
    n_pad = num_tiles * tile_n

    # Zero-pad rows: padded x rows are 0, so they contribute exactly 0 to -sum(td*x).
    if n_pad != N:
        x_in = jnp.zeros((n_pad, V), x.dtype).at[:N].set(x)
        t_in = jnp.zeros((n_pad, 1), jnp.int32).at[:N].set(tgt2d)
    else:
        x_in, t_in = x, tgt2d

    tile_bytes = tile_n * row_bytes
    vmem_limit = int(min(max(6 * tile_bytes + (1 << 20), 16 << 20), 56 << 20))

    kernel = functools.partial(
        _label_smoothing_kernel, confidence=confidence, smooth_val=smooth_val)

    td_pad, partials = pl.pallas_call(
        kernel,
        out_shape=(
            jax.ShapeDtypeStruct((n_pad, V), x.dtype),              # true_dist
            jax.ShapeDtypeStruct((num_tiles * 8, 128), jnp.float32),  # per-tile partial losses
        ),
        grid=(num_tiles,),
        in_specs=[
            pl.BlockSpec((tile_n, V), lambda i: (i, 0)),
            pl.BlockSpec((tile_n, 1), lambda i: (i, 0)),
        ],
        out_specs=(
            pl.BlockSpec((tile_n, V), lambda i: (i, 0)),
            pl.BlockSpec((8, 128), lambda i: (i, 0)),
        ),
        compiler_params=pltpu.CompilerParams(
            dimension_semantics=("parallel",),
            vmem_limit_bytes=vmem_limit,
        ),
    )(x_in, t_in)

    # Hoisted constant: per row, sum_v xlogy(td, td) = xlogy(conf) + (size-1)*xlogy(smooth).
    const_per_row = _xlogy_const(confidence) + (size - 1) * _xlogy_const(smooth_val)
    loss = jnp.sum(partials[::8, 0]) + jnp.float32(N * const_per_row)
    true_dist = td_pad[:N]
    return loss, true_dist


def _reference(x, target, size, smoothing):
    confidence = 1.0 - smoothing
    smooth_val = smoothing / (size - 1)
    td = jnp.full(x.shape, smooth_val, dtype=x.dtype)
    td = td.at[jnp.arange(x.shape[0]), target].set(confidence)
    xlogy = jnp.where(td > 0, td * jnp.log(jnp.where(td > 0, td, 1.0)), 0.0)
    return jnp.sum(xlogy - td * x), td


if __name__ == "__main__":
    key = jax.random.PRNGKey(0)

    # --- test 1: small single-tile case (matches the module's basic usage) ---
    N, SIZE, SMOOTHING = 8, 32, 0.1
    kx, kt, key = (*jax.random.split(key, 2), None)
    kx, kt = jax.random.split(jax.random.PRNGKey(0))
    logits = jax.random.normal(kx, (N, SIZE), dtype=jnp.float32)
    x = jax.nn.log_softmax(logits, axis=-1)            # KLDivLoss expects log-probs
    target = jax.random.randint(kt, (N,), 0, SIZE, dtype=jnp.int32)

    loss, true_dist = label_smoothing_loss(x, target, SIZE, SMOOTHING)
    loss = jax.block_until_ready(loss)
    true_dist = jax.block_until_ready(true_dist)
    ref_loss, ref_td = _reference(x, target, SIZE, SMOOTHING)
    assert jnp.allclose(loss, ref_loss, rtol=1e-4, atol=1e-3), (loss, ref_loss)
    assert jnp.allclose(true_dist, ref_td, rtol=1e-6, atol=1e-6)

    # --- test 2: multi-tile + row-padding path (grid of 4, N not a tile multiple) ---
    N2, SIZE2, SM2 = 50, 256, 0.2
    k2x, k2t = jax.random.split(jax.random.PRNGKey(1))
    logits2 = jax.random.normal(k2x, (N2, SIZE2), dtype=jnp.float32)
    x2 = jax.nn.log_softmax(logits2, axis=-1)
    target2 = jax.random.randint(k2t, (N2,), 0, SIZE2, dtype=jnp.int32)

    loss2, td2 = label_smoothing_loss(x2, target2, SIZE2, SM2, tile_n=16)
    loss2 = jax.block_until_ready(loss2)
    td2 = jax.block_until_ready(td2)
    ref_loss2, ref_td2 = _reference(x2, target2, SIZE2, SM2)
    assert jnp.allclose(loss2, ref_loss2, rtol=1e-4, atol=1e-3), (loss2, ref_loss2)
    assert jnp.allclose(td2, ref_td2, rtol=1e-6, atol=1e-6)

    # TODO(synk): the Annotated-Transformer variant also masks a padding_idx column /
    # padded rows; the original module given here does not, so neither does this kernel.
    print("KERNEL_OK")
</pallas_src>

<mosaic_0001>
module attributes {stable_mosaic.version = 11 : i64} {
  func.func @_label_smoothing_kernel(%arg0: i32, %arg1: memref<8x32xf32, #tpu.memory_space<vmem>>, %arg2: memref<8x1xi32, #tpu.memory_space<vmem>>, %arg3: memref<8x32xf32, #tpu.memory_space<vmem>>, %arg4: memref<8x128xf32, #tpu.memory_space<vmem>>) attributes {dimension_semantics = [#tpu.dimension_semantics<parallel>], iteration_bounds = array<i64: 1>, scalar_prefetch = 0 : i64, scratch_operands = 0 : i64, tpu.core_type = #tpu.core_type<tc>, window_params = [{transform_indices = @transform_0, window_bounds = array<i64: 8, 32>}, {transform_indices = @transform_1, window_bounds = array<i64: 8, 1>}, {transform_indices = @transform_2, window_bounds = array<i64: 8, 32>}, {transform_indices = @transform_3, window_bounds = array<i64: 8, 128>}]} {
    %c0 = arith.constant 0 : index
    %c0_0 = arith.constant 0 : index
    %0 = vector.load %arg1[%c0, %c0_0] : memref<8x32xf32, #tpu.memory_space<vmem>>, vector<8x32xf32>
    %c0_1 = arith.constant 0 : index
    %c0_2 = arith.constant 0 : index
    %1 = vector.load %arg2[%c0_1, %c0_2] : memref<8x1xi32, #tpu.memory_space<vmem>>, vector<8x1xi32>
    %2 = tpu.iota {dimensions = array<i32: 1>} : vector<8x32xi32>
    %3 = vector.broadcast %1 : vector<8x1xi32> to vector<8x32xi32>
    %4 = arith.cmpi eq, %2, %3 : vector<8x32xi32>
    %cst = arith.constant 0.899999976 : f32
    %cst_3 = arith.constant 0.0032258064 : f32
    %5 = vector.broadcast %cst : f32 to vector<8x32xf32>
    %6 = vector.broadcast %cst_3 : f32 to vector<8x32xf32>
    %7 = arith.select %4, %5, %6 : vector<8x32xi1>, vector<8x32xf32>
    %c0_4 = arith.constant 0 : index
    %c0_5 = arith.constant 0 : index
    %8 = vector.load %arg3[%c0_4, %c0_5] : memref<8x32xf32, #tpu.memory_space<vmem>>, vector<8x32xf32>
    tpu.vector_store %arg3[%c0_4, %c0_5], %7 {strides = array<i32>} : memref<8x32xf32, #tpu.memory_space<vmem>>, vector<8x32xf32>,
    %9 = arith.mulf %7, %0 : vector<8x32xf32>
    %10 = vector.shape_cast %9 : vector<8x32xf32> to vector<1x8x32xf32>
    %cst_6 = arith.constant dense<0.000000e+00> : vector<1xf32>
    %11 = vector.multi_reduction <add>, %10, %cst_6 [1, 2] : vector<1x8x32xf32> to vector<1xf32>
    %12 = vector.shape_cast %11 : vector<1xf32> to vector<1x1x1xf32>
    %13 = vector.extract %12[0, 0, 0] : f32 from vector<1x1x1xf32>
    %cst_7 = arith.constant 0.000000e+00 : f32
    %14 = arith.subf %cst_7, %13 : f32
    %15 = vector.broadcast %14 : f32 to vector<8x128xf32>
    %c0_8 = arith.constant 0 : index
    %c0_9 = arith.constant 0 : index
    %16 = vector.load %arg4[%c0_8, %c0_9] : memref<8x128xf32, #tpu.memory_space<vmem>>, vector<8x128xf32>
    tpu.vector_store %arg4[%c0_8, %c0_9], %15 {strides = array<i32>} : memref<8x128xf32, #tpu.memory_space<vmem>>, vector<8x128xf32>,
    return
  }
  func.func @transform_0(%arg0: i32) -> (i32, i32) {
    %c0_i32 = arith.constant 0 : i32
    %c0_i32_0 = arith.constant 0 : i32
    return %arg0, %c0_i32 : i32, i32
  }
  func.func @transform_1(%arg0: i32) -> (i32, i32) {
    %c0_i32 = arith.constant 0 : i32
    %c0_i32_0 = arith.constant 0 : i32
    return %arg0, %c0_i32 : i32, i32
  }
  func.func @transform_2(%arg0: i32) -> (i32, i32) {
    %c0_i32 = arith.constant 0 : i32
    %c0_i32_0 = arith.constant 0 : i32
    return %arg0, %c0_i32 : i32, i32
  }
  func.func @transform_3(%arg0: i32) -> (i32, i32) {
    %c0_i32 = arith.constant 0 : i32
    %c0_i32_0 = arith.constant 0 : i32
    return %arg0, %c0_i32 : i32, i32
  }
}

</mosaic_0001>

<bundles_post_ra>
// kernel: tpu_custom_call.1
= control target key start
LH: loop header
LB: loop body
LE: loop exit
PB: predicated region body
PF: predicated region fallthrough
CT: control target
= control target key end

     0   :  { %9 = vsyncpa [#allocation3], 0  ;;  %s177_s0 = inlined_call_operand.vmem [shape: f32[8,32], index: 0, kind: input, shape index: {}]   ;;  %s178_s1 = inlined_call_operand.vmem [shape: s32[8,1], index: 1, kind: input, shape index: {}]   ;;  %s179_s2 = inlined_call_operand.hbm [shape: f32[8,32], index: 2, kind: output, shape index: {0}]   ;;  %s180_s3 = inlined_call_operand.hbm [shape: f32[8,128], index: 3, kind: output, shape index: {1}]  }
   0x1   :  { %v16_v0 = vld [vmem:[%s178_s1] sm:$0xff] }
   0x2   :  { %10 = vsyncpa [#allocation5], 0  ;;  %v123_v1 = vmov 0   ;;  %v17_v2 = vlaneseq  ;;  %v15_v5 = vld [vmem:[%s177_s0] sm:$0xff]  ;;  %vm24_vm0 = vcmask 261120   ;;  %s125_s1 = smov [#allocation2]  }
   0x3   :  { %74 = vset.pattern.permute.xlu0 %v123_v1  ;;  %v124_v6 = vmov 0.0032258064   ;;  %s46_s16 = sshll.u32 %s125_s1, 4  ;;  %s47_s16 = int_to_ptr.vmem [resolvable:$true] %s46_s16 }
   0x4   :  { %20 = vperm.xlu0 %74, %v16_v0   ;;  %v18_v3 = vand.u32 127, %v17_v2  ;;  %s75_s17 = scalar_lea.vmem %s47_s16, 128  ;;  %p80_p1 = scmp.lt.s32.totalorder %s47_s16, %s47_s16 }
   0x5   :  { %p76_p0 = scmp.ne.s32.totalorder %s47_s16, %s75_s17  ;;  %p81_p2 = scmp.lt.s32.totalorder %s75_s17, %s75_s17 }
   0x7   :  { %p82_p3 = por %p81_p2, %p80_p1 }
   0x9   :  { %p83_p4 = pnand %p82_p3, %p76_p0 }
  0x83   :  { %v21_v4 = vpop.permute.xlu0 %20 }
  0x84   :  { %vm22_vm1 = vcmp.eq.s32.totalorder %v18_v3, %v21_v4 }
  0x85   :  { %v23_v7 = vsel %vm22_vm1, 0.9, %v124_v6 }
  0x86   :  { %v26_v8 = vmul.f32 %v23_v7, %v15_v5  ;;  %25 = vst.msk [vmem:[#allocation2] sm:$0xff] %vm24_vm0, %v23_v7 }
  0x88   :  { %v27_v9 = vsel %vm24_vm0, %v26_v8, 0.0 }
  0x89   :  { %28 = vadd.xlane.f32.xlu0 %v27_v9 }
  0x8a   :  { %86 = shalt.err (!%p83_p4)
}
  0x8b   :  { %s87_s19 = scalar_lea.hbm %s179_s2, 128 }
  0x8c   :  { %p88_p5 = scmp.ne.s32.totalorder %s179_s2, %s87_s19  ;;  %p91_p6 = scmp.lt.u32.totalorder %s87_s19, %s179_s2 }
  0x8e   :  { %p93_p7 = pnand %p91_p6, %p88_p5 }
  0x90   :  { %96 = shalt.err (!%p93_p7)
}
  0x91   :  { %49 = dma.vmem_to_hbm [thread:$0]  %s47_s16, 128, %s179_s2, [#allocation3]  }
  0x92   :  { %s126_s26 = smov [#allocation4]  }
  0x93   :  { %s56_s27 = sshll.u32 %s126_s26, 4  ;;  %s57_s27 = int_to_ptr.vmem [resolvable:$true] %s56_s27 }
  0x94   :  { %s97_s30 = scalar_lea.vmem %s57_s27, 128  ;;  %p102_p9 = scmp.lt.s32.totalorder %s57_s27, %s57_s27 }
  0x95   :  { %p98_p8 = scmp.ne.s32.totalorder %s57_s27, %s97_s30  ;;  %p103_p10 = scmp.lt.s32.totalorder %s97_s30, %s97_s30 }
  0x97   :  { %p104_p11 = por %p103_p10, %p102_p9 }
  0x99   :  { %p105_p12 = pnand %p104_p11, %p98_p8 }
 0x116   :  { %v29_v10 = vpop.xlane.xlu0 %28 }
 0x117   :  { %v30_v11 = vrot.slane %v29_v10, 4 }
 0x119   :  { %v31_v12 = vadd.f32 %v30_v11, %v29_v10 }
 0x11b   :  { %v32_v13 = vrot.slane %v31_v12, 2 }
 0x11d   :  { %v33_v14 = vadd.f32 %v32_v13, %v31_v12 }
 0x11f   :  { %v34_v15 = vrot.slane %v33_v14, 1 }
 0x121   :  { %v35_v16 = vadd.f32 %v34_v15, %v33_v14 }
 0x123   :  { %68 = vpush %v35_v16 }
 0x154   :  { %s69_s28 = spop %68 }
 0x155   :  { %s37_s29 = ssub.f32 0.0, %s69_s28 }
 0x157   :  { %v38_v17 = vstv %s37_s29 }
 0x158   :  { %39 = vst [vmem:[#allocation4] sm:$0xff] %v38_v17 }
 0x159   :  { %108 = shalt.err (!%p105_p12)
}
 0x15a   :  { %s109_s5 = scalar_lea.hbm %s180_s3, 128 }
 0x15b   :  { %p110_p13 = scmp.ne.s32.totalorder %s180_s3, %s109_s5  ;;  %p113_p0 = scmp.lt.u32.totalorder %s109_s5, %s180_s3 }
 0x15d   :  { %p115_p1 = pnand %p113_p0, %p110_p13 }
 0x15f   :  { %118 = shalt.err (!%p115_p1)
}
 0x160   :  { %59 = dma.vmem_to_hbm [thread:$0]  %s57_s27, 128, %s180_s3, [#allocation5]  }
 0x161   :  { %119 = dma.done.wait [#allocation3], 128  }
 0x162   :  { %120 = vsyncadd [#allocation3], 4294967168 }
 0x163   :  { %121 = dma.done.wait [#allocation5], 128  }
 0x164   :  { %122 = vsyncadd [#allocation5], 4294967168 }
 0x165   :  { %66 = vsyncpa [#allocation3], 1 }
 0x166   :  { %67 = vsyncpa [#allocation5], 1 }

</bundles_post_ra>
